<compile_context>
chip_gen: v6e
topology: v6e:2x2x1
jax: 0.10.0
libtpu: 0.0.40
codegen_flags: <defaults>
</compile_context>

<pallas_src>
import jax
import jax.numpy as jnp
from jax.experimental import pallas as pl
from jax.experimental.pallas import tpu as pltpu


def _round_up(n, m):
    return ((n + m - 1) // m) * m


def _sigmoid(x):
    # Exact rewrite of the logistic: one EUP op (tanh) + cheap VPU work.
    return 0.5 * jnp.tanh(0.5 * x) + 0.5


# -----------------------------------------------------------------------------
# Pass 1: hoisted, h-independent projections (parallel over time blocks).
# -----------------------------------------------------------------------------
def _hoist_kernel(
    x_ref, ind_ref, ev_ref,
    w_x_ref, b_lstm_ref, w_proj_ref, b_proj_ref,
    w_ig_b_ref, b_ig_ref, w_eg_b_ref, b_eg_ref,
    xg_ref, indh_ref, igp_ref, egp_ref,
):
    ts, bp = x_ref.shape[0], x_ref.shape[1]
    m = ts * bp
    wdt = w_x_ref.dtype  # MXU operand dtype (f32 or bf16)

    # Merge (time_block, batch) -> rows so the MXU sees M = ts*bp, not M = bp.
    x2 = x_ref[...].reshape(m, x_ref.shape[2]).astype(wdt)
    ind2 = ind_ref[...].reshape(m, ind_ref.shape[2]).astype(wdt)
    ev2 = ev_ref[...].reshape(m, ev_ref.shape[2]).astype(wdt)

    xg = jnp.dot(x2, w_x_ref[...], preferred_element_type=jnp.float32) + b_lstm_ref[...]
    ind_h = jnp.maximum(
        jnp.dot(ind2, w_proj_ref[...], preferred_element_type=jnp.float32)
        + b_proj_ref[...],
        0.0,
    )
    igp = (jnp.dot(ind_h.astype(wdt), w_ig_b_ref[...],
                   preferred_element_type=jnp.float32) + b_ig_ref[...])
    egp = (jnp.dot(ev2, w_eg_b_ref[...],
                   preferred_element_type=jnp.float32) + b_eg_ref[...])

    h4 = xg_ref.shape[2]
    hh = indh_ref.shape[2]
    xg_ref[...] = xg.reshape(ts, bp, h4)
    indh_ref[...] = ind_h.reshape(ts, bp, hh)
    igp_ref[...] = igp.reshape(ts, bp, hh)
    egp_ref[...] = egp.reshape(ts, bp, hh)


# -----------------------------------------------------------------------------
# Pass 2: serial recurrence.  grid = (batch_tiles, time_blocks); h/c carried in
# VMEM scratch; only the three h-dependent K=Hp matmuls remain per step.
# -----------------------------------------------------------------------------
def _recurrence_kernel(
    xg_ref, indh_ref, igp_ref, egp_ref, ev_ref,
    h0_ref, c0_ref,
    w_hh_ref, w_ig_top_ref, w_eg_top_ref,
    h_out_ref, c_out_ref,
    h_state, c_state,
):
    Hp = h0_ref.shape[-1]
    TS = xg_ref.shape[0]           # static time-block length
    wdt = w_hh_ref.dtype

    @pl.when(pl.program_id(1) == 0)
    def _init():
        h_state[...] = h0_ref[...]
        c_state[...] = c0_ref[...]

    h = h_state[...]
    c = c_state[...]

    for s in range(TS):            # static unroll over the time block
        # ---- nn.LSTMCell: x-part + bias precomputed; only h @ W_hh here ----
        gates = xg_ref[s] + jnp.dot(h.astype(wdt), w_hh_ref[...],
                                    preferred_element_type=jnp.float32)
        # Gate blocks are Hp-wide -> slices land on 128-lane boundaries.
        i_g = _sigmoid(gates[:, 0 * Hp:1 * Hp])
        f_g = _sigmoid(gates[:, 1 * Hp:2 * Hp])
        g_g = jnp.tanh(gates[:, 2 * Hp:3 * Hp])
        o_g = _sigmoid(gates[:, 3 * Hp:4 * Hp])
        c = f_g * c + i_g * g_g
        h_lstm = o_g * jnp.tanh(c)

        # ---- indicator gate: bottom half (ind_h @ W + b) precomputed ----
        ig = _sigmoid(igp_ref[s] + jnp.dot(h_lstm.astype(wdt), w_ig_top_ref[...],
                                           preferred_element_type=jnp.float32))
        h_gated = h_lstm * ig + indh_ref[s] * (1.0 - ig)

        # ---- event gate: bottom half (ev @ W + b) precomputed ----
        eg = _sigmoid(egp_ref[s] + jnp.dot(h_gated.astype(wdt), w_eg_top_ref[...],
                                           preferred_element_type=jnp.float32))
        h = h_gated * eg + ev_ref[s] * (1.0 - eg)

        # Lane-dense per-step output stores.
        h_out_ref[s] = h.astype(h_out_ref.dtype)
        c_out_ref[s] = c.astype(c_out_ref.dtype)

    h_state[...] = h
    c_state[...] = c


# -----------------------------------------------------------------------------
# Parameters (PyTorch layout) and padded / pre-packed kernel parameters.
# -----------------------------------------------------------------------------
def init_torch_params(key, input_size, hidden_size):
    """Deterministic synthetic parameters in PyTorch shapes."""
    ks = jax.random.split(key, 10)
    H, I = hidden_size, input_size
    s = 0.1
    return dict(
        w_ih=jax.random.normal(ks[0], (4 * H, H), jnp.float32) * s,
        w_hh=jax.random.normal(ks[1], (4 * H, H), jnp.float32) * s,
        b_ih=jax.random.normal(ks[2], (4 * H,), jnp.float32) * s,
        b_hh=jax.random.normal(ks[3], (4 * H,), jnp.float32) * s,
        w_proj=jax.random.normal(ks[4], (H, I), jnp.float32) * s,
        b_proj=jax.random.normal(ks[5], (H,), jnp.float32) * s,
        w_ig=jax.random.normal(ks[6], (H, 2 * H), jnp.float32) * s,
        b_ig=jax.random.normal(ks[7], (H,), jnp.float32) * s,
        w_eg=jax.random.normal(ks[8], (H, 2 * H), jnp.float32) * s,
        b_eg=jax.random.normal(ks[9], (H,), jnp.float32) * s,
    )


def prepare_params(tp, input_size, hidden_size, param_dtype=jnp.float32):
    """Pre-transpose, split (h-part vs other-part), and zero-pad to 128 lanes.

    param_dtype: dtype of MXU weight operands (use jnp.bfloat16 on v6e/v7x for
    native-rate MXU and halved weight VMEM; biases stay f32 and accumulation
    is always f32).  Padded rows/cols are zero so padded lanes of h/c stay 0.
    """
    H, I = hidden_size, input_size
    Hp = _round_up(max(H, 1), 128)
    Ip = _round_up(max(I, 1), 128)

    w_ih_t = tp["w_ih"].T            # [H, 4H], gate order i,f,g,o along columns
    w_hh_t = tp["w_hh"].T            # [H, 4H]
    b_full = tp["b_ih"] + tp["b_hh"]  # [4H]

    w_x = jnp.zeros((Hp, 4 * Hp), jnp.float32)    # acts on x   (hoisted pass)
    w_hh = jnp.zeros((Hp, 4 * Hp), jnp.float32)   # acts on h   (recurrence)
    b_lstm = jnp.zeros((1, 4 * Hp), jnp.float32)
    for g in range(4):
        w_x = w_x.at[:H, g * Hp:g * Hp + H].set(w_ih_t[:, g * H:(g + 1) * H])
        w_hh = w_hh.at[:H, g * Hp:g * Hp + H].set(w_hh_t[:, g * H:(g + 1) * H])
        b_lstm = b_lstm.at[0, g * Hp:g * Hp + H].set(b_full[g * H:(g + 1) * H])

    w_proj = jnp.zeros((Ip, Hp), jnp.float32).at[:I, :H].set(tp["w_proj"].T)
    b_proj = jnp.zeros((1, Hp), jnp.float32).at[0, :H].set(tp["b_proj"])

    w_ig_t = tp["w_ig"].T            # [2H, H]: rows 0:H -> h, rows H:2H -> ind_h
    w_ig_top = jnp.zeros((Hp, Hp), jnp.float32).at[:H, :H].set(w_ig_t[:H])
    w_ig_bot = jnp.zeros((Hp, Hp), jnp.float32).at[:H, :H].set(w_ig_t[H:])
    b_ig = jnp.zeros((1, Hp), jnp.float32).at[0, :H].set(tp["b_ig"])

    w_eg_t = tp["w_eg"].T
    w_eg_top = jnp.zeros((Hp, Hp), jnp.float32).at[:H, :H].set(w_eg_t[:H])
    w_eg_bot = jnp.zeros((Hp, Hp), jnp.float32).at[:H, :H].set(w_eg_t[H:])
    b_eg = jnp.zeros((1, Hp), jnp.float32).at[0, :H].set(tp["b_eg"])

    cast = lambda w: w.astype(param_dtype)
    return dict(
        hidden_size=H, input_size=I, Hp=Hp, Ip=Ip,
        w_x=cast(w_x), w_hh=cast(w_hh), b_lstm=b_lstm,
        w_proj=cast(w_proj), b_proj=b_proj,
        w_ig_top=cast(w_ig_top), w_ig_bot=cast(w_ig_bot), b_ig=b_ig,
        w_eg_top=cast(w_eg_top), w_eg_bot=cast(w_eg_bot), b_eg=b_eg,
    )


# -----------------------------------------------------------------------------
# Wrappers
# -----------------------------------------------------------------------------
def stock_lstm_sequence(x_seq, h0, c0, ind_seq, ev_seq, params,
                        time_block=8, batch_block=None):
    """Run T recurrent StockLSTMCell steps (hoisted pass + recurrence pass)."""
    T, B, H = x_seq.shape
    I = ind_seq.shape[-1]
    assert H == params["hidden_size"], f"Expected x dim {params['hidden_size']}, got {H}"
    assert I == params["input_size"], f"Expected indicators dim {params['input_size']}, got {I}"
    Hp, Ip = params["Hp"], params["Ip"]
    Bp = _round_up(max(B, 1), 8)

    ts = max(1, min(time_block, T))        # time-block (statically unrolled)
    Tp = _round_up(T, ts)
    bb = Bp if batch_block is None else _round_up(min(batch_block, Bp), 8)
    if Bp % bb != 0:
        bb = Bp
    n_b, n_t = Bp // bb, Tp // ts

    def pad3(a, tlen, rows, cols):
        return jnp.pad(a.astype(jnp.float32),
                       ((0, tlen - a.shape[0]),
                        (0, rows - a.shape[1]),
                        (0, cols - a.shape[2])))

    def pad2(a, rows, cols):
        return jnp.pad(a.astype(jnp.float32),
                       ((0, rows - a.shape[0]), (0, cols - a.shape[1])))

    xp = pad3(x_seq, Tp, Bp, Hp)
    indp = pad3(ind_seq, Tp, Bp, Ip)
    evp = pad3(ev_seq, Tp, Bp, Hp)
    h0p = pad2(h0, Bp, Hp)
    c0p = pad2(c0, Bp, Hp)

    cparams = pltpu.CompilerParams(
        dimension_semantics=("parallel",),
        vmem_limit_bytes=32 * 1024 * 1024)

    per_t3 = lambda t: (t, 0, 0)
    const2 = lambda t: (0, 0)

    # ---- Pass 1: hoisted h-independent projections ----
    xg_pre, indh_pre, igp_pre, egp_pre = pl.pallas_call(
        _hoist_kernel,
        out_shape=(jax.ShapeDtypeStruct((Tp, Bp, 4 * Hp), jnp.float32),
                   jax.ShapeDtypeStruct((Tp, Bp, Hp), jnp.float32),
                   jax.ShapeDtypeStruct((Tp, Bp, Hp), jnp.float32),
                   jax.ShapeDtypeStruct((Tp, Bp, Hp), jnp.float32)),
        grid_spec=pltpu.PrefetchScalarGridSpec(
            num_scalar_prefetch=0,
            grid=(n_t,),
            in_specs=[
                pl.BlockSpec((ts, Bp, Hp), per_t3),       # x_seq
                pl.BlockSpec((ts, Bp, Ip), per_t3),       # indicators_seq
                pl.BlockSpec((ts, Bp, Hp), per_t3),       # event_impact_seq
                pl.BlockSpec((Hp, 4 * Hp), const2),       # w_x   (W_ih part)
                pl.BlockSpec((1, 4 * Hp), const2),        # b_lstm
                pl.BlockSpec((Ip, Hp), const2),           # w_proj
                pl.BlockSpec((1, Hp), const2),            # b_proj
                pl.BlockSpec((Hp, Hp), const2),           # w_ig bottom (ind_h part)
                pl.BlockSpec((1, Hp), const2),            # b_ig
                pl.BlockSpec((Hp, Hp), const2),           # w_eg bottom (event part)
                pl.BlockSpec((1, Hp), const2),            # b_eg
            ],
            out_specs=[
                pl.BlockSpec((ts, Bp, 4 * Hp), per_t3),
                pl.BlockSpec((ts, Bp, Hp), per_t3),
                pl.BlockSpec((ts, Bp, Hp), per_t3),
                pl.BlockSpec((ts, Bp, Hp), per_t3),
            ],
        ),
        compiler_params=cparams,
    )(xp, indp, evp,
      params["w_x"], params["b_lstm"],
      params["w_proj"], params["b_proj"],
      params["w_ig_bot"], params["b_ig"],
      params["w_eg_bot"], params["b_eg"])

    # ---- Pass 2: serial recurrence ----
    per_bt = lambda b, t: (t, b, 0)
    bmap = lambda b, t: (b, 0)
    constw = lambda b, t: (0, 0)

    h_seq_p, c_seq_p = pl.pallas_call(
        _recurrence_kernel,
        out_shape=(jax.ShapeDtypeStruct((Tp, Bp, Hp), jnp.float32),
                   jax.ShapeDtypeStruct((Tp, Bp, Hp), jnp.float32)),
        grid_spec=pltpu.PrefetchScalarGridSpec(
            num_scalar_prefetch=0,
            grid=(n_b, n_t),
            in_specs=[
                pl.BlockSpec((ts, bb, 4 * Hp), per_bt),   # xg_pre
                pl.BlockSpec((ts, bb, Hp), per_bt),       # ind_hidden (precomputed)
                pl.BlockSpec((ts, bb, Hp), per_bt),       # igp_pre
                pl.BlockSpec((ts, bb, Hp), per_bt),       # egp_pre
                pl.BlockSpec((ts, bb, Hp), per_bt),       # event_impact
                pl.BlockSpec((bb, Hp), bmap),             # h0
                pl.BlockSpec((bb, Hp), bmap),             # c0
                pl.BlockSpec((Hp, 4 * Hp), constw),       # w_hh (resident in VMEM)
                pl.BlockSpec((Hp, Hp), constw),           # w_ig top (h part)
                pl.BlockSpec((Hp, Hp), constw),           # w_eg top (h part)
            ],
            out_specs=[
                pl.BlockSpec((ts, bb, Hp), per_bt),       # h_seq
                pl.BlockSpec((ts, bb, Hp), per_bt),       # c_seq
            ],
            scratch_shapes=[
                pltpu.VMEM((bb, Hp), jnp.float32),        # h carried across time
                pltpu.VMEM((bb, Hp), jnp.float32),        # c carried across time
            ],
        ),
        compiler_params=pltpu.CompilerParams(
            dimension_semantics=("parallel", "arbitrary"),
            vmem_limit_bytes=32 * 1024 * 1024),
    )(xg_pre, indh_pre, igp_pre, egp_pre, evp, h0p, c0p,
      params["w_hh"], params["w_ig_top"], params["w_eg_top"])

    return h_seq_p[:T, :B, :H], c_seq_p[:T, :B, :H]


def stock_lstm_cell(x, h_prev, c_prev, indicators, event_impact, params):
    """Single-step forward, exactly matching StockLSTMCell.forward (T=1 case)."""
    h_seq, c_seq = stock_lstm_sequence(
        x[None], h_prev, c_prev, indicators[None], event_impact[None], params,
        time_block=1)
    return h_seq[0], c_seq[0]


# -----------------------------------------------------------------------------
# Pure-JAX reference mirroring the PyTorch forward, for verification.
# -----------------------------------------------------------------------------
def _reference_cell(tp, x, h_prev, c_prev, indicators, event_impact):
    H = h_prev.shape[-1]
    gates = (x @ tp["w_ih"].T + tp["b_ih"]
             + h_prev @ tp["w_hh"].T + tp["b_hh"])
    i = jax.nn.sigmoid(gates[:, :H])
    f = jax.nn.sigmoid(gates[:, H:2 * H])
    g = jnp.tanh(gates[:, 2 * H:3 * H])
    o = jax.nn.sigmoid(gates[:, 3 * H:])
    c_next = f * c_prev + i * g
    h_next = o * jnp.tanh(c_next)
    ind_hidden = jax.nn.relu(indicators @ tp["w_proj"].T + tp["b_proj"])
    ig = jax.nn.sigmoid(
        jnp.concatenate([h_next, ind_hidden], -1) @ tp["w_ig"].T + tp["b_ig"])
    h_next = h_next * ig + ind_hidden * (1 - ig)
    eg = jax.nn.sigmoid(
        jnp.concatenate([h_next, event_impact], -1) @ tp["w_eg"].T + tp["b_eg"])
    h_next = h_next * eg + event_impact * (1 - eg)
    return h_next, c_next


if __name__ == "__main__":
    B, I, H, T = 4, 16, 32, 8  # batch, input_size, hidden_size, seq length

    key = jax.random.PRNGKey(0)
    k_param, k_x, k_h, k_c, k_ind, k_ev = jax.random.split(key, 6)

    tparams = init_torch_params(k_param, I, H)
    params_f32 = prepare_params(tparams, I, H, param_dtype=jnp.float32)    # v5e path
    params_bf16 = prepare_params(tparams, I, H, param_dtype=jnp.bfloat16)  # v6e/v7x path

    x_seq = jax.random.normal(k_x, (T, B, H), jnp.float32)
    ind_seq = jax.random.normal(k_ind, (T, B, I), jnp.float32)
    ev_seq = jax.random.normal(k_ev, (T, B, H), jnp.float32)
    h0 = jax.random.normal(k_h, (B, H), jnp.float32)
    c0 = jax.random.normal(k_c, (B, H), jnp.float32)

    # Single step (the module's forward).
    h1, c1 = stock_lstm_cell(x_seq[0], h0, c0, ind_seq[0], ev_seq[0], params_f32)

    # Time-fused recurrence: hoisted projections + weights-resident recurrence.
    h_seq, c_seq = stock_lstm_sequence(x_seq, h0, c0, ind_seq, ev_seq, params_f32)
    h_seq_bf, c_seq_bf = stock_lstm_sequence(x_seq, h0, c0, ind_seq, ev_seq, params_bf16)
    jax.block_until_ready((h1, c1, h_seq, c_seq, h_seq_bf, c_seq_bf))

    # References.
    with jax.default_matmul_precision("highest"):
        h_ref, c_ref = _reference_cell(tparams, x_seq[0], h0, c0, ind_seq[0], ev_seq[0])
        hs, cs = [], []
        h, c = h0, c0
        for t in range(T):
            h, c = _reference_cell(tparams, x_seq[t], h, c, ind_seq[t], ev_seq[t])
            hs.append(h)
            cs.append(c)
        hs_ref = jnp.stack(hs)
        cs_ref = jnp.stack(cs)

    # f32-weight path: tight tolerance; bf16 MXU-operand path: relaxed tolerance.
    assert jnp.allclose(h1, h_ref, atol=2e-3, rtol=2e-3), "single-step h mismatch"
    assert jnp.allclose(c1, c_ref, atol=2e-3, rtol=2e-3), "single-step c mismatch"
    assert jnp.allclose(h_seq, hs_ref, atol=2e-3, rtol=2e-3), "sequence h mismatch (f32)"
    assert jnp.allclose(c_seq, cs_ref, atol=2e-3, rtol=2e-3), "sequence c mismatch (f32)"
    assert jnp.allclose(h_seq_bf, hs_ref, atol=5e-2, rtol=5e-2), "sequence h mismatch (bf16)"
    assert jnp.allclose(c_seq_bf, cs_ref, atol=5e-2, rtol=5e-2), "sequence c mismatch (bf16)"

    print("KERNEL_OK")
</pallas_src>

<mosaic_0001>
module attributes {stable_mosaic.version = 11 : i64} {
  func.func @_hoist_kernel(%arg0: i32, %arg1: memref<1x8x128xf32, #tpu.memory_space<vmem>>, %arg2: memref<1x8x128xf32, #tpu.memory_space<vmem>>, %arg3: memref<1x8x128xf32, #tpu.memory_space<vmem>>, %arg4: memref<128x512xf32, #tpu.memory_space<vmem>>, %arg5: memref<1x512xf32, #tpu.memory_space<vmem>>, %arg6: memref<128x128xf32, #tpu.memory_space<vmem>>, %arg7: memref<1x128xf32, #tpu.memory_space<vmem>>, %arg8: memref<128x128xf32, #tpu.memory_space<vmem>>, %arg9: memref<1x128xf32, #tpu.memory_space<vmem>>, %arg10: memref<128x128xf32, #tpu.memory_space<vmem>>, %arg11: memref<1x128xf32, #tpu.memory_space<vmem>>, %arg12: memref<1x8x512xf32, #tpu.memory_space<vmem>>, %arg13: memref<1x8x128xf32, #tpu.memory_space<vmem>>, %arg14: memref<1x8x128xf32, #tpu.memory_space<vmem>>, %arg15: memref<1x8x128xf32, #tpu.memory_space<vmem>>) attributes {dimension_semantics = [#tpu.dimension_semantics<parallel>], iteration_bounds = array<i64: 1>, scalar_prefetch = 0 : i64, scratch_operands = 0 : i64, tpu.core_type = #tpu.core_type<tc>, window_params = [{transform_indices = @transform_0, window_bounds = array<i64: 1, 8, 128>}, {transform_indices = @transform_1, window_bounds = array<i64: 1, 8, 128>}, {transform_indices = @transform_2, window_bounds = array<i64: 1, 8, 128>}, {pipeline_mode = #tpu.pipeline_mode<synchronous>, transform_indices = @transform_3, window_bounds = array<i64: 128, 512>}, {pipeline_mode = #tpu.pipeline_mode<synchronous>, transform_indices = @transform_4, window_bounds = array<i64: 1, 512>}, {pipeline_mode = #tpu.pipeline_mode<synchronous>, transform_indices = @transform_5, window_bounds = array<i64: 128, 128>}, {pipeline_mode = #tpu.pipeline_mode<synchronous>, transform_indices = @transform_6, window_bounds = array<i64: 1, 128>}, {pipeline_mode = #tpu.pipeline_mode<synchronous>, transform_indices = @transform_7, window_bounds = array<i64: 128, 128>}, {pipeline_mode = #tpu.pipeline_mode<synchronous>, transform_indices = @transform_8, window_bounds = array<i64: 1, 128>}, {pipeline_mode = #tpu.pipeline_mode<synchronous>, transform_indices = @transform_9, window_bounds = array<i64: 128, 128>}, {pipeline_mode = #tpu.pipeline_mode<synchronous>, transform_indices = @transform_10, window_bounds = array<i64: 1, 128>}, {transform_indices = @transform_11, window_bounds = array<i64: 1, 8, 512>}, {transform_indices = @transform_12, window_bounds = array<i64: 1, 8, 128>}, {transform_indices = @transform_13, window_bounds = array<i64: 1, 8, 128>}, {transform_indices = @transform_14, window_bounds = array<i64: 1, 8, 128>}]} {
    %c0 = arith.constant 0 : index
    %c0_0 = arith.constant 0 : index
    %c0_1 = arith.constant 0 : index
    %0 = vector.load %arg1[%c0, %c0_0, %c0_1] : memref<1x8x128xf32, #tpu.memory_space<vmem>>, vector<1x8x128xf32>
    %1 = vector.shape_cast %0 : vector<1x8x128xf32> to vector<8x128xf32>
    %c0_2 = arith.constant 0 : index
    %c0_3 = arith.constant 0 : index
    %c0_4 = arith.constant 0 : index
    %2 = vector.load %arg2[%c0_2, %c0_3, %c0_4] : memref<1x8x128xf32, #tpu.memory_space<vmem>>, vector<1x8x128xf32>
    %3 = vector.shape_cast %2 : vector<1x8x128xf32> to vector<8x128xf32>
    %c0_5 = arith.constant 0 : index
    %c0_6 = arith.constant 0 : index
    %c0_7 = arith.constant 0 : index
    %4 = vector.load %arg3[%c0_5, %c0_6, %c0_7] : memref<1x8x128xf32, #tpu.memory_space<vmem>>, vector<1x8x128xf32>
    %5 = vector.shape_cast %4 : vector<1x8x128xf32> to vector<8x128xf32>
    %c0_8 = arith.constant 0 : index
    %c0_9 = arith.constant 0 : index
    %6 = vector.load %arg4[%c0_8, %c0_9] : memref<128x512xf32, #tpu.memory_space<vmem>>, vector<128x512xf32>
    %cst = arith.constant dense<0.000000e+00> : vector<8x512xf32>
    %7 = tpu.matmul %1, %6, %cst {dimension_numbers = #tpu.dot_dimension_numbers<[1], [0], [0], [1], [0, 0, 1, 1], [], []>} : vector<8x128xf32>, vector<128x512xf32>, vector<8x512xf32> -> vector<8x512xf32>
    %c0_10 = arith.constant 0 : index
    %c0_11 = arith.constant 0 : index
    %8 = vector.load %arg5[%c0_10, %c0_11] : memref<1x512xf32, #tpu.memory_space<vmem>>, vector<1x512xf32>
    %9 = vector.broadcast %8 : vector<1x512xf32> to vector<8x512xf32>
    %10 = arith.addf %7, %9 : vector<8x512xf32>
    %c0_12 = arith.constant 0 : index
    %c0_13 = arith.constant 0 : index
    %11 = vector.load %arg6[%c0_12, %c0_13] : memref<128x128xf32, #tpu.memory_space<vmem>>, vector<128x128xf32>
    %cst_14 = arith.constant dense<0.000000e+00> : vector<8x128xf32>
    %12 = tpu.matmul %3, %11, %cst_14 {dimension_numbers = #tpu.dot_dimension_numbers<[1], [0], [0], [1], [0, 0, 1, 1], [], []>} : vector<8x128xf32>, vector<128x128xf32>, vector<8x128xf32> -> vector<8x128xf32>
    %c0_15 = arith.constant 0 : index
    %c0_16 = arith.constant 0 : index
    %13 = vector.load %arg7[%c0_15, %c0_16] : memref<1x128xf32, #tpu.memory_space<vmem>>, vector<1x128xf32>
    %14 = vector.broadcast %13 : vector<1x128xf32> to vector<8x128xf32>
    %15 = arith.addf %12, %14 : vector<8x128xf32>
    %cst_17 = arith.constant 0.000000e+00 : f32
    %16 = vector.broadcast %cst_17 : f32 to vector<8x128xf32>
    %17 = arith.maximumf %15, %16 : vector<8x128xf32>
    %c0_18 = arith.constant 0 : index
    %c0_19 = arith.constant 0 : index
    %18 = vector.load %arg8[%c0_18, %c0_19] : memref<128x128xf32, #tpu.memory_space<vmem>>, vector<128x128xf32>
    %cst_20 = arith.constant dense<0.000000e+00> : vector<8x128xf32>
    %19 = tpu.matmul %17, %18, %cst_20 {dimension_numbers = #tpu.dot_dimension_numbers<[1], [0], [0], [1], [0, 0, 1, 1], [], []>} : vector<8x128xf32>, vector<128x128xf32>, vector<8x128xf32> -> vector<8x128xf32>
    %c0_21 = arith.constant 0 : index
    %c0_22 = arith.constant 0 : index
    %20 = vector.load %arg9[%c0_21, %c0_22] : memref<1x128xf32, #tpu.memory_space<vmem>>, vector<1x128xf32>
    %21 = vector.broadcast %20 : vector<1x128xf32> to vector<8x128xf32>
    %22 = arith.addf %19, %21 : vector<8x128xf32>
    %c0_23 = arith.constant 0 : index
    %c0_24 = arith.constant 0 : index
    %23 = vector.load %arg10[%c0_23, %c0_24] : memref<128x128xf32, #tpu.memory_space<vmem>>, vector<128x128xf32>
    %cst_25 = arith.constant dense<0.000000e+00> : vector<8x128xf32>
    %24 = tpu.matmul %5, %23, %cst_25 {dimension_numbers = #tpu.dot_dimension_numbers<[1], [0], [0], [1], [0, 0, 1, 1], [], []>} : vector<8x128xf32>, vector<128x128xf32>, vector<8x128xf32> -> vector<8x128xf32>
    %c0_26 = arith.constant 0 : index
    %c0_27 = arith.constant 0 : index
    %25 = vector.load %arg11[%c0_26, %c0_27] : memref<1x128xf32, #tpu.memory_space<vmem>>, vector<1x128xf32>
    %26 = vector.broadcast %25 : vector<1x128xf32> to vector<8x128xf32>
    %27 = arith.addf %24, %26 : vector<8x128xf32>
    %28 = vector.shape_cast %10 : vector<8x512xf32> to vector<1x8x512xf32>
    %c0_28 = arith.constant 0 : index
    %c0_29 = arith.constant 0 : index
    %c0_30 = arith.constant 0 : index
    %29 = vector.load %arg12[%c0_28, %c0_29, %c0_30] : memref<1x8x512xf32, #tpu.memory_space<vmem>>, vector<1x8x512xf32>
    tpu.vector_store %arg12[%c0_28, %c0_29, %c0_30], %28 {strides = array<i32>} : memref<1x8x512xf32, #tpu.memory_space<vmem>>, vector<1x8x512xf32>,
    %30 = vector.shape_cast %17 : vector<8x128xf32> to vector<1x8x128xf32>
    %c0_31 = arith.constant 0 : index
    %c0_32 = arith.constant 0 : index
    %c0_33 = arith.constant 0 : index
    %31 = vector.load %arg13[%c0_31, %c0_32, %c0_33] : memref<1x8x128xf32, #tpu.memory_space<vmem>>, vector<1x8x128xf32>
    tpu.vector_store %arg13[%c0_31, %c0_32, %c0_33], %30 {strides = array<i32>} : memref<1x8x128xf32, #tpu.memory_space<vmem>>, vector<1x8x128xf32>,
    %32 = vector.shape_cast %22 : vector<8x128xf32> to vector<1x8x128xf32>
    %c0_34 = arith.constant 0 : index
    %c0_35 = arith.constant 0 : index
    %c0_36 = arith.constant 0 : index
    %33 = vector.load %arg14[%c0_34, %c0_35, %c0_36] : memref<1x8x128xf32, #tpu.memory_space<vmem>>, vector<1x8x128xf32>
    tpu.vector_store %arg14[%c0_34, %c0_35, %c0_36], %32 {strides = array<i32>} : memref<1x8x128xf32, #tpu.memory_space<vmem>>, vector<1x8x128xf32>,
    %34 = vector.shape_cast %27 : vector<8x128xf32> to vector<1x8x128xf32>
    %c0_37 = arith.constant 0 : index
    %c0_38 = arith.constant 0 : index
    %c0_39 = arith.constant 0 : index
    %35 = vector.load %arg15[%c0_37, %c0_38, %c0_39] : memref<1x8x128xf32, #tpu.memory_space<vmem>>, vector<1x8x128xf32>
    tpu.vector_store %arg15[%c0_37, %c0_38, %c0_39], %34 {strides = array<i32>} : memref<1x8x128xf32, #tpu.memory_space<vmem>>, vector<1x8x128xf32>,
    return
  }
  func.func @transform_0(%arg0: i32) -> (i32, i32, i32) {
    %c0_i32 = arith.constant 0 : i32
    %c0_i32_0 = arith.constant 0 : i32
    %c0_i32_1 = arith.constant 0 : i32
    return %arg0, %c0_i32, %c0_i32_0 : i32, i32, i32
  }
  func.func @transform_1(%arg0: i32) -> (i32, i32, i32) {
    %c0_i32 = arith.constant 0 : i32
    %c0_i32_0 = arith.constant 0 : i32
    %c0_i32_1 = arith.constant 0 : i32
    return %arg0, %c0_i32, %c0_i32_0 : i32, i32, i32
  }
  func.func @transform_2(%arg0: i32) -> (i32, i32, i32) {
    %c0_i32 = arith.constant 0 : i32
    %c0_i32_0 = arith.constant 0 : i32
    %c0_i32_1 = arith.constant 0 : i32
    return %arg0, %c0_i32, %c0_i32_0 : i32, i32, i32
  }
  func.func @transform_3(%arg0: i32) -> (i32, i32) {
    %c0_i32 = arith.constant 0 : i32
    %c0_i32_0 = arith.constant 0 : i32
    %c0_i32_1 = arith.constant 0 : i32
    return %c0_i32, %c0_i32_0 : i32, i32
  }
  func.func @transform_4(%arg0: i32) -> (i32, i32) {
    %c0_i32 = arith.constant 0 : i32
    %c0_i32_0 = arith.constant 0 : i32
    %c0_i32_1 = arith.constant 0 : i32
    return %c0_i32, %c0_i32_0 : i32, i32
  }
  func.func @transform_5(%arg0: i32) -> (i32, i32) {
    %c0_i32 = arith.constant 0 : i32
    %c0_i32_0 = arith.constant 0 : i32
    %c0_i32_1 = arith.constant 0 : i32
    return %c0_i32, %c0_i32_0 : i32, i32
  }
  func.func @transform_6(%arg0: i32) -> (i32, i32) {
    %c0_i32 = arith.constant 0 : i32
    %c0_i32_0 = arith.constant 0 : i32
    %c0_i32_1 = arith.constant 0 : i32
    return %c0_i32, %c0_i32_0 : i32, i32
  }
  func.func @transform_7(%arg0: i32) -> (i32, i32) {
    %c0_i32 = arith.constant 0 : i32
    %c0_i32_0 = arith.constant 0 : i32
    %c0_i32_1 = arith.constant 0 : i32
    return %c0_i32, %c0_i32_0 : i32, i32
  }
  func.func @transform_8(%arg0: i32) -> (i32, i32) {
    %c0_i32 = arith.constant 0 : i32
    %c0_i32_0 = arith.constant 0 : i32
    %c0_i32_1 = arith.constant 0 : i32
    return %c0_i32, %c0_i32_0 : i32, i32
  }
  func.func @transform_9(%arg0: i32) -> (i32, i32) {
    %c0_i32 = arith.constant 0 : i32
    %c0_i32_0 = arith.constant 0 : i32
    %c0_i32_1 = arith.constant 0 : i32
    return %c0_i32, %c0_i32_0 : i32, i32
  }
  func.func @transform_10(%arg0: i32) -> (i32, i32) {
    %c0_i32 = arith.constant 0 : i32
    %c0_i32_0 = arith.constant 0 : i32
    %c0_i32_1 = arith.constant 0 : i32
    return %c0_i32, %c0_i32_0 : i32, i32
  }
  func.func @transform_11(%arg0: i32) -> (i32, i32, i32) {
    %c0_i32 = arith.constant 0 : i32
    %c0_i32_0 = arith.constant 0 : i32
    %c0_i32_1 = arith.constant 0 : i32
    return %arg0, %c0_i32, %c0_i32_0 : i32, i32, i32
  }
  func.func @transform_12(%arg0: i32) -> (i32, i32, i32) {
    %c0_i32 = arith.constant 0 : i32
    %c0_i32_0 = arith.constant 0 : i32
    %c0_i32_1 = arith.constant 0 : i32
    return %arg0, %c0_i32, %c0_i32_0 : i32, i32, i32
  }
  func.func @transform_13(%arg0: i32) -> (i32, i32, i32) {
    %c0_i32 = arith.constant 0 : i32
    %c0_i32_0 = arith.constant 0 : i32
    %c0_i32_1 = arith.constant 0 : i32
    return %arg0, %c0_i32, %c0_i32_0 : i32, i32, i32
  }
  func.func @transform_14(%arg0: i32) -> (i32, i32, i32) {
    %c0_i32 = arith.constant 0 : i32
    %c0_i32_0 = arith.constant 0 : i32
    %c0_i32_1 = arith.constant 0 : i32
    return %arg0, %c0_i32, %c0_i32_0 : i32, i32, i32
  }
}

</mosaic_0001>

<bundles_post_ra>
// kernel: tpu_custom_call.1
= control target key start
LH: loop header
LB: loop body
LE: loop exit
PB: predicated region body
PF: predicated region fallthrough
CT: control target
= control target key end

     0   :  { %20 = vsyncpa [#allocation3], 0  ;;  %s1327_s0 = inlined_call_operand.hbm [shape: f32[1,8,128], index: 0, kind: input, shape index: {}]   ;;  %s1328_s1 = inlined_call_operand.hbm [shape: f32[1,8,128], index: 1, kind: input, shape index: {}]   ;;  %s1329_s2 = inlined_call_operand.hbm [shape: f32[1,8,128], index: 2, kind: input, shape index: {}]   ;;  %s1330_s3 = inlined_call_operand.hbm [shape: f32[128,512], index: 3, kind: input, shape index: {}]   ;;  %s1331_s4 = inlined_call_operand.vmem [shape: f32[1,512], index: 4, kind: input, shape index: {}]   ;;  %s1332_s5 = inlined_call_operand.hbm [shape: f32[128,128], index: 5, kind: input, shape index: {}]   ;;  %s1333_s6 = inlined_call_operand.vmem [shape: f32[1,128], index: 6, kind: input, shape index: {}]   ;;  %s1334_s7 = inlined_call_operand.hbm [shape: f32[128,128], index: 7, kind: input, shape index: {}]   ;;  %s1335_s8 = inlined_call_operand.vmem [shape: f32[1,128], index: 8, kind: input, shape index: {}]   ;;  %s1336_s9 = inlined_call_operand.hbm [shape: f32[128,128], index: 9, kind: input, shape index: {}]   ;;  %s1337_s10 = inlined_call_operand.vmem [shape: f32[1,128], index: 10, kind: input, shape index: {}]   ;;  %s1338_s11 = inlined_call_operand.hbm [shape: f32[1,8,512], index: 11, kind: output, shape index: {0}]   ;;  %s1339_s12 = inlined_call_operand.hbm [shape: f32[1,8,128], index: 12, kind: output, shape index: {1}]   ;;  %s1340_s13 = inlined_call_operand.hbm [shape: f32[1,8,128], index: 13, kind: output, shape index: {2}]   ;;  %s1341_s14 = inlined_call_operand.hbm [shape: f32[1,8,128], index: 14, kind: output, shape index: {3}]  }
   0x1   :  { %21 = vsyncpa [#allocation6], 0 }
   0x2   :  { %22 = vsyncpa [#allocation9], 0 }
   0x3   :  { %23 = vsyncpa [#allocation12], 0 }
   0x4   :  { %24 = vsyncpa [#allocation4], 0 }
   0x5   :  { %25 = vsyncpa [#allocation16], 0 }
   0x6   :  { %26 = vsyncpa [#allocation19], 0  ;;  %s1121_s29 = smov [#allocation5]   ;;  %s1122_s15 = smov [#allocation8]  }
   0x7   :  { %s43_s30 = sshll.u32 %s1121_s29, 4  ;;  %s62_s16 = sshll.u32 %s1122_s15, 4  ;;  %s44_s30 = int_to_ptr.vmem [resolvable:$true] %s43_s30  ;;  %s63_s16 = int_to_ptr.vmem [resolvable:$true] %s62_s16 }
   0x8   :  { %s895_s17 = scalar_lea.vmem %s44_s30, 128  ;;  %p900_p1 = scmp.lt.s32.totalorder %s44_s30, %s44_s30 }
   0x9   :  { %p896_p0 = scmp.ne.s32.totalorder %s44_s30, %s895_s17  ;;  %p901_p2 = scmp.lt.s32.totalorder %s895_s17, %s895_s17 }
   0xb   :  { %p902_p3 = por %p901_p2, %p900_p1 }
   0xd   :  { %p903_p4 = pnand %p902_p3, %p896_p0 }
   0xf   :  { %906 = shalt.err (!%p903_p4)
}
  0x10   :  { %46 = dma.hbm_to_vmem [thread:$0]  %s1328_s1, 128, %s44_s30, [#allocation6]  }
  0x11   :  { %s915_s20 = scalar_lea.vmem %s63_s16, 8192  ;;  %p920_p6 = scmp.lt.s32.totalorder %s63_s16, %s63_s16 }
  0x12   :  { %p916_p5 = scmp.ne.s32.totalorder %s63_s16, %s915_s20  ;;  %p921_p7 = scmp.lt.s32.totalorder %s915_s20, %s915_s20 }
  0x14   :  { %p922_p8 = por %p921_p7, %p920_p6 }
  0x16   :  { %p923_p9 = pnand %p922_p8, %p916_p5 }
  0x18   :  { %926 = shalt.err (!%p923_p9)
}
  0x19   :  { %s1123_s21 = smov 512   ;;  %s1124_s22 = smov 32  }
  0x1a   :  { %68 = dma.hbm_to_vmem [thread:$0]  %s1330_s3, 8192, %s63_s16, [#allocation9], %s1123_s21, %s1123_s21, %s1124_s22  }
  0x1b   :  { %s1125_s25 = smov [#allocation11]   ;;  %s1126_s27 = smov [#allocation2]  }
  0x1c   :  { %s90_s26 = sshll.u32 %s1125_s25, 4  ;;  %s33_s28 = sshll.u32 %s1126_s27, 4  ;;  %s91_s26 = int_to_ptr.vmem [resolvable:$true] %s90_s26  ;;  %s34_s28 = int_to_ptr.vmem [resolvable:$true] %s33_s28 }
  0x1d   :  { %s935_s1 = scalar_lea.vmem %s91_s26, 2048  ;;  %p940_p11 = scmp.lt.s32.totalorder %s91_s26, %s91_s26 }
  0x1e   :  { %p936_p10 = scmp.ne.s32.totalorder %s91_s26, %s935_s1  ;;  %p941_p12 = scmp.lt.s32.totalorder %s935_s1, %s935_s1 }
  0x20   :  { %p942_p13 = por %p941_p12, %p940_p11 }
  0x22   :  { %p943_p0 = pnand %p942_p13, %p936_p10 }
  0x24   :  { %946 = shalt.err (!%p943_p0)
}
  0x25   :  { %s1127_s29 = smov 128   ;;  %s1128_s30 = smov 8  }
  0x26   :  { %96 = dma.hbm_to_vmem [thread:$0]  %s1334_s7, 2048, %s91_s26, [#allocation12], %s1127_s29, %s1127_s29, %s1128_s30  }
  0x27   :  { %s955_s16 = scalar_lea.vmem %s34_s28, 128  ;;  %p960_p2 = scmp.lt.s32.totalorder %s34_s28, %s34_s28 }
  0x28   :  { %p956_p1 = scmp.ne.s32.totalorder %s34_s28, %s955_s16  ;;  %p961_p3 = scmp.lt.s32.totalorder %s955_s16, %s955_s16 }
  0x2a   :  { %p962_p4 = por %p961_p3, %p960_p2 }
  0x2c   :  { %p963_p5 = pnand %p962_p4, %p956_p1 }
  0x2e   :  { %966 = shalt.err (!%p963_p5)
}
  0x2f   :  { %36 = dma.hbm_to_vmem [thread:$0]  %s1327_s0, 128, %s34_s28, [#allocation3]  }
  0x30   :  { %s1129_s19 = smov [#allocation7]   ;;  %s1130_s21 = smov [#allocation10]  }
  0x31   :  { %s53_s20 = sshll.u32 %s1129_s19, 4  ;;  %s76_s22 = sshll.u32 %s1130_s21, 4  ;;  %s54_s20 = int_to_ptr.vmem [resolvable:$true] %s53_s20  ;;  %s77_s22 = int_to_ptr.vmem [resolvable:$true] %s76_s22 }
  0x32   :  { %s975_s23 = scalar_lea.vmem %s54_s20, 128  ;;  %p980_p7 = scmp.lt.s32.totalorder %s54_s20, %s54_s20 }
  0x33   :  { %p976_p6 = scmp.ne.s32.totalorder %s54_s20, %s975_s23  ;;  %p981_p8 = scmp.lt.s32.totalorder %s975_s23, %s975_s23 }
  0x35   :  { %p982_p9 = por %p981_p8, %p980_p7 }
  0x37   :  { %p983_p10 = pnand %p982_p9, %p976_p6 }
  0x39   :  { %986 = shalt.err (!%p983_p10)
}
  0x3a   :  { %56 = dma.hbm_to_vmem [thread:$0]  %s1329_s2, 128, %s54_s20, [#allocation6]  }
  0x3b   :  { %s995_s25 = scalar_lea.vmem %s77_s22, 2048  ;;  %p1000_p12 = scmp.lt.s32.totalorder %s77_s22, %s77_s22 }
  0x3c   :  { %p996_p11 = scmp.ne.s32.totalorder %s77_s22, %s995_s25  ;;  %p1001_p13 = scmp.lt.s32.totalorder %s995_s25, %s995_s25 }
  0x3e   :  { %p1002_p0 = por %p1001_p13, %p1000_p12 }
  0x40   :  { %p1003_p1 = pnand %p1002_p0, %p996_p11 }
  0x42   :  { %1006 = shalt.err (!%p1003_p1)
}
  0x43   :  { %82 = dma.hbm_to_vmem [thread:$0]  %s1332_s5, 2048, %s77_s22, [#allocation9], %s1127_s29, %s1127_s29, %s1128_s30  }
  0x44   :  { %s1131_s27 = smov [#allocation13]  }
  0x45   :  { %s104_s28 = sshll.u32 %s1131_s27, 4  ;;  %s105_s28 = int_to_ptr.vmem [resolvable:$true] %s104_s28 }
  0x46   :  { %s1015_s1 = scalar_lea.vmem %s105_s28, 2048  ;;  %p1020_p3 = scmp.lt.s32.totalorder %s105_s28, %s105_s28 }
  0x47   :  { %p1016_p2 = scmp.ne.s32.totalorder %s105_s28, %s1015_s1  ;;  %p1021_p4 = scmp.lt.s32.totalorder %s1015_s1, %s1015_s1 }
  0x49   :  { %p1022_p5 = por %p1021_p4, %p1020_p3 }
  0x4b   :  { %p1023_p6 = pnand %p1022_p5, %p1016_p2 }
  0x4d   :  { %1026 = shalt.err (!%p1023_p6)
}
  0x4e   :  { %110 = dma.hbm_to_vmem [thread:$0]  %s1336_s9, 2048, %s105_s28, [#allocation12], %s1127_s29, %s1127_s29, %s1128_s30  }
  0x4f   :  { %1107 = dma.done.wait [#allocation3], 128  }
  0x50   :  { %1108 = vsyncadd [#allocation3], 4294967168 }
  0x51   :  { %1109 = dma.done.wait [#allocation6], 256  }
  0x52   :  { %1110 = vsyncadd [#allocation6], 4294967040 }
  0x53   :  { %1111 = dma.done.wait [#allocation9], 10240  }
  0x54   :  { %1112 = vsyncadd [#allocation9], 4294957056 }
  0x55   :  { %1113 = dma.done.wait [#allocation12], 4096  }
  0x56   :  { %1114 = vsyncadd [#allocation12], 4294963200  ;;  %v1132_v0 = vmov 0.0   ;;  %v198_v1 = vld [vmem:[#allocation8 + $0x1e8] sm:$0xff]  ;;  %v197_v2 = vld [vmem:[#allocation8 + $0x1e0] sm:$0xff]  ;;  %vm1133_vm0 = vmmov 0  }
  0x57   :  { %287 = vmatprep.mubr.f32.mxu0 %v1132_v0  ;;  %358 = vmatprep.mubr.f32.mxu1 %v1132_v0  ;;  %v194_v3 = vld [vmem:[#allocation8 + $0x1c8] sm:$0xff]  ;;  %v193_v4 = vld [vmem:[#allocation8 + $0x1c0] sm:$0xff]  ;;  %v200_v21 = vld [vmem:[#allocation8 + $0x1f8] sm:$0xff]  ;;  %s1135_s17 = smov [#allocation14]  }
  0x58   :  { %223 = vmatprep.subr.mxu0 %v198_v1  ;;  %v190_v5 = vld [vmem:[#allocation8 + $0x1a8] sm:$0xff]  ;;  %v189_v6 = vld [vmem:[#allocation8 + $0x1a0] sm:$0xff]  ;;  %294 = vmatprep.subr.mxu1 %v200_v21  ;;  %v199_v22 = vld [vmem:[#allocation8 + $0x1f0] sm:$0xff]  ;;  %s658_s18 = sshll.u32 %s1135_s17, 4  ;;  %s659_s18 = int_to_ptr.vmem [resolvable:$true] %s658_s18 }
  0x59   :  { %224 = vmatpush1.msra.mxu0 %v197_v2  ;;  %v186_v7 = vld [vmem:[#allocation8 + $0x188] sm:$0xff]  ;;  %v185_v8 = vld [vmem:[#allocation8 + $0x180] sm:$0xff]  ;;  %v196_v23 = vld [vmem:[#allocation8 + $0x1d8] sm:$0xff]  ;;  %295 = vmatpush1.msra.mxu1 %v199_v22 }
  0x5a   :  { %225 = vmatprep.subr.mxu0 %v194_v3  ;;  %v182_v9 = vld [vmem:[#allocation8 + $0x168] sm:$0xff]  ;;  %v181_v10 = vld [vmem:[#allocation8 + $0x160] sm:$0xff]  ;;  %v195_v24 = vld [vmem:[#allocation8 + $0x1d0] sm:$0xff]  ;;  %296 = vmatprep.subr.mxu1 %v196_v23 }
  0x5b   :  { %226 = vmatpush1.msra.mxu0 %v193_v4  ;;  %v178_v11 = vld [vmem:[#allocation8 + $0x148] sm:$0xff]  ;;  %v177_v12 = vld [vmem:[#allocation8 + $0x140] sm:$0xff]  ;;  %v192_v26 = vld [vmem:[#allocation8 + $0x1b8] sm:$0xff]  ;;  %297 = vmatpush1.msra.mxu1 %v195_v24 }
  0x5c   :  { %227 = vmatprep.subr.mxu0 %v190_v5  ;;  %v174_v13 = vld [vmem:[#allocation8 + $0x128] sm:$0xff]  ;;  %v173_v14 = vld [vmem:[#allocation8 + $0x120] sm:$0xff]  ;;  %v191_v28 = vld [vmem:[#allocation8 + $0x1b0] sm:$0xff]  ;;  %298 = vmatprep.subr.mxu1 %v192_v26 }
  0x5d   :  { %228 = vmatpush1.msra.mxu0 %v189_v6  ;;  %v170_v15 = vld [vmem:[#allocation8 + $0x108] sm:$0xff]  ;;  %v169_v16 = vld [vmem:[#allocation8 + $0x100] sm:$0xff]  ;;  %v188_v30 = vld [vmem:[#allocation8 + $0x198] sm:$0xff]  ;;  %299 = vmatpush1.msra.mxu1 %v191_v28 }
  0x5e   :  { %229 = vmatprep.subr.mxu0 %v186_v7  ;;  %v166_v17 = vld [vmem:[#allocation8 + $0xe8] sm:$0xff]  ;;  %v165_v18 = vld [vmem:[#allocation8 + $0xe0] sm:$0xff]  ;;  %v187_v32 = vld [vmem:[#allocation8 + $0x190] sm:$0xff]  ;;  %300 = vmatprep.subr.mxu1 %v188_v30 }
  0x5f   :  { %230 = vmatpush1.msra.mxu0 %v185_v8  ;;  %v162_v19 = vld [vmem:[#allocation8 + $0xc8] sm:$0xff]  ;;  %v161_v20 = vld [vmem:[#allocation8 + $0xc0] sm:$0xff]  ;;  %v184_v34 = vld [vmem:[#allocation8 + $0x178] sm:$0xff]  ;;  %301 = vmatpush1.msra.mxu1 %v187_v32 }
  0x60   :  { %231 = vmatprep.subr.mxu0 %v182_v9  ;;  %v158_v25 = vld [vmem:[#allocation8 + $0xa8] sm:$0xff]  ;;  %v157_v27 = vld [vmem:[#allocation8 + $0xa0] sm:$0xff]  ;;  %v183_v36 = vld [vmem:[#allocation8 + $0x170] sm:$0xff]  ;;  %302 = vmatprep.subr.mxu1 %v184_v34 }
  0x61   :  { %232 = vmatpush1.msra.mxu0 %v181_v10  ;;  %v154_v29 = vld [vmem:[#allocation8 + $0x88] sm:$0xff]  ;;  %v153_v31 = vld [vmem:[#allocation8 + $0x80] sm:$0xff]  ;;  %v180_v38 = vld [vmem:[#allocation8 + $0x158] sm:$0xff]  ;;  %303 = vmatpush1.msra.mxu1 %v183_v36 }
  0x62   :  { %233 = vmatprep.subr.mxu0 %v178_v11  ;;  %v150_v33 = vld [vmem:[#allocation8 + $0x68] sm:$0xff]  ;;  %v149_v35 = vld [vmem:[#allocation8 + $0x60] sm:$0xff]  ;;  %v179_v40 = vld [vmem:[#allocation8 + $0x150] sm:$0xff]  ;;  %304 = vmatprep.subr.mxu1 %v180_v38 }
  0x63   :  { %234 = vmatpush1.msra.mxu0 %v177_v12  ;;  %v146_v37 = vld [vmem:[#allocation8 + $0x48] sm:$0xff]  ;;  %v145_v39 = vld [vmem:[#allocation8 + $0x40] sm:$0xff]  ;;  %v176_v42 = vld [vmem:[#allocation8 + $0x138] sm:$0xff]  ;;  %305 = vmatpush1.msra.mxu1 %v179_v40 }
  0x64   :  { %235 = vmatprep.subr.mxu0 %v174_v13  ;;  %v142_v41 = vld [vmem:[#allocation8 + $0x28] sm:$0xff]  ;;  %v141_v43 = vld [vmem:[#allocation8 + $0x20] sm:$0xff]  ;;  %v175_v44 = vld [vmem:[#allocation8 + $0x130] sm:$0xff]  ;;  %306 = vmatprep.subr.mxu1 %v176_v42 }
  0x65   :  { %236 = vmatpush1.msra.mxu0 %v173_v14  ;;  %v138_v45 = vld [vmem:[#allocation8 + $0x8] sm:$0xff]  ;;  %v172_v46 = vld [vmem:[#allocation8 + $0x118] sm:$0xff]  ;;  %v137_v47 = vld [vmem:[#allocation8] sm:$0xff]  ;;  %307 = vmatpush1.msra.mxu1 %v175_v44 }
  0x66   :  { %237 = vmatprep.subr.mxu0 %v170_v15  ;;  %v171_v48 = vld [vmem:[#allocation8 + $0x110] sm:$0xff]  ;;  %v1245_v49 = vld [vmem:[#allocation2] sm:$0xff]  ;;  %v380_v50 = vld [vmem:[#allocation10 + $0x78] sm:$0xff]  ;;  %308 = vmatprep.subr.mxu1 %v172_v46 }
  0x67   :  { %238 = vmatpush1.msra.mxu0 %v169_v16  ;;  %309 = vmatpush1.msra.mxu1 %v171_v48  ;;  %v168_v51 = vld [vmem:[#allocation8 + $0xf8] sm:$0xff]  ;;  %v379_v52 = vld [vmem:[#allocation10 + $0x70] sm:$0xff]  ;;  %v378_v55 = vld [vmem:[#allocation10 + $0x68] sm:$0xff] }
  0x68   :  { %239 = vmatprep.subr.mxu0 %v166_v17  ;;  %v167_v53 = vld [vmem:[#allocation8 + $0xf0] sm:$0xff]  ;;  %v164_v54 = vld [vmem:[#allocation8 + $0xd8] sm:$0xff]  ;;  %310 = vmatprep.subr.mxu1 %v168_v51  ;;  %v377_v58 = vld [vmem:[#allocation10 + $0x60] sm:$0xff] }
  0x69   :  { %240 = vmatpush1.msra.mxu0 %v165_v18  ;;  %v163_v56 = vld [vmem:[#allocation8 + $0xd0] sm:$0xff]  ;;  %311 = vmatpush1.msra.mxu1 %v167_v53  ;;  %v160_v57 = vld [vmem:[#allocation8 + $0xb8] sm:$0xff]  ;;  %v374_v4 = vld [vmem:[#allocation10 + $0x48] sm:$0xff]  ;;  %v203_v53 = vlaneseq }
  0x6a   :  { %241 = vmatprep.subr.mxu0 %v162_v19  ;;  %312 = vmatprep.subr.mxu1 %v164_v54  ;;  %v159_v59 = vld [vmem:[#allocation8 + $0xb0] sm:$0xff]  ;;  %v156_v60 = vld [vmem:[#allocation8 + $0x98] sm:$0xff]  ;;  %v373_v6 = vld [vmem:[#allocation10 + $0x40] sm:$0xff] }
  0x6b   :  { %242 = vmatpush1.msra.mxu0 %v161_v20  ;;  %313 = vmatpush1.msra.mxu1 %v163_v56  ;;  %v376_v61 = vld [vmem:[#allocation10 + $0x58] sm:$0xff]  ;;  %v155_v62 = vld [vmem:[#allocation8 + $0x90] sm:$0xff]  ;;  %v370_v9 = vld [vmem:[#allocation10 + $0x28] sm:$0xff]  ;;  %v204_v54 = vshrl.u32 %v203_v53, 7 }
  0x6c   :  { %243 = vmatprep.subr.mxu0 %v158_v25  ;;  %314 = vmatprep.subr.mxu1 %v160_v57  ;;  %v152_v63 = vld [vmem:[#allocation8 + $0x78] sm:$0xff]  ;;  %v375_v1 = vld [vmem:[#allocation10 + $0x50] sm:$0xff]  ;;  %v369_v10 = vld [vmem:[#allocation10 + $0x20] sm:$0xff] }
  0x6d   :  { %244 = vmatpush1.msra.mxu0 %v157_v27  ;;  %315 = vmatpush1.msra.mxu1 %v159_v59  ;;  %v151_v2 = vld [vmem:[#allocation8 + $0x70] sm:$0xff]  ;;  %v148_v3 = vld [vmem:[#allocation8 + $0x58] sm:$0xff]  ;;  %v366_v13 = vld [vmem:[#allocation10 + $0x8] sm:$0xff]  ;;  %v209_v57 = vsub.s32 1, %v204_v54 }
  0x6e   :  { %245 = vmatprep.subr.mxu0 %v154_v29  ;;  %316 = vmatprep.subr.mxu1 %v156_v60  ;;  %v147_v5 = vld [vmem:[#allocation8 + $0x50] sm:$0xff]  ;;  %v372_v7 = vld [vmem:[#allocation10 + $0x38] sm:$0xff]  ;;  %v365_v14 = vld [vmem:[#allocation10] sm:$0xff] }
  0x6f   :  { %246 = vmatpush1.msra.mxu0 %v153_v31  ;;  %317 = vmatpush1.msra.mxu1 %v155_v62  ;;  %v371_v8 = vld [vmem:[#allocation10 + $0x30] sm:$0xff]  ;;  %v368_v11 = vld [vmem:[#allocation10 + $0x18] sm:$0xff]  ;;  %v565_v24 = vld [vmem:[#allocation13 + $0x68] sm:$0xff] }
  0x70   :  { %247 = vmatprep.subr.mxu0 %v150_v33  ;;  %318 = vmatprep.subr.mxu1 %v152_v63  ;;  %v367_v12 = vld [vmem:[#allocation10 + $0x10] sm:$0xff]  ;;  %v144_v16 = vld [vmem:[#allocation8 + $0x38] sm:$0xff]  ;;  %v472_v25 = vld [vmem:[#allocation11 + $0x68] sm:$0xff] }
  0x71   :  { %248 = vmatpush1.msra.mxu0 %v149_v35  ;;  %319 = vmatpush1.msra.mxu1 %v151_v2  ;;  %v135_v15 = vld [vmem:[#allocation5] sm:$0xff]  ;;  %v140_v18 = vld [vmem:[#allocation8 + $0x18] sm:$0xff]  ;;  %v564_v26 = vld [vmem:[#allocation13 + $0x60] sm:$0xff] }
  0x72   :  { %249 = vmatprep.subr.mxu0 %v146_v37  ;;  %320 = vmatprep.subr.mxu1 %v148_v3  ;;  %v143_v17 = vld [vmem:[#allocation8 + $0x30] sm:$0xff]  ;;  %v567_v20 = vld [vmem:[#allocation13 + $0x78] sm:$0xff]  ;;  %v471_v27 = vld [vmem:[#allocation11 + $0x60] sm:$0xff] }
  0x73   :  { %250 = vmatpush1.msra.mxu0 %v145_v39  ;;  %321 = vmatpush1.msra.mxu1 %v147_v5  ;;  %v139_v19 = vld [vmem:[#allocation8 + $0x10] sm:$0xff]  ;;  %v474_v21 = vld [vmem:[#allocation11 + $0x78] sm:$0xff]  ;;  %v561_v32 = vld [vmem:[#allocation13 + $0x48] sm:$0xff]  ;;  %v213_v5 = vsub.s32 2, %v204_v54 }
  0x74   :  { %251 = vmatprep.subr.mxu0 %v142_v41  ;;  %322 = vmatprep.subr.mxu1 %v144_v16  ;;  %v566_v22 = vld [vmem:[#allocation13 + $0x70] sm:$0xff]  ;;  %v563_v28 = vld [vmem:[#allocation13 + $0x58] sm:$0xff]  ;;  %v468_v33 = vld [vmem:[#allocation11 + $0x48] sm:$0xff] }
  0x75   :  { %252 = vmatpush1.msra.mxu0 %v141_v43  ;;  %323 = vmatpush1.msra.mxu1 %v143_v17  ;;  %v473_v23 = vld [vmem:[#allocation11 + $0x70] sm:$0xff]  ;;  %v470_v29 = vld [vmem:[#allocation11 + $0x58] sm:$0xff]  ;;  %v560_v34 = vld [vmem:[#allocation13 + $0x40] sm:$0xff] }
  0x76   :  { %253 = vmatprep.subr.mxu0 %v138_v45  ;;  %324 = vmatprep.subr.mxu1 %v140_v18  ;;  %v562_v30 = vld [vmem:[#allocation13 + $0x50] sm:$0xff]  ;;  %v467_v35 = vld [vmem:[#allocation11 + $0x40] sm:$0xff]  ;;  %v559_v36 = vld [vmem:[#allocation13 + $0x38] sm:$0xff] }
  0x77   :  { %254 = vmatpush1.msra.mxu0 %v137_v47  ;;  %325 = vmatpush1.msra.mxu1 %v139_v19  ;;  %v469_v31 = vld [vmem:[#allocation11 + $0x50] sm:$0xff]  ;;  %v466_v37 = vld [vmem:[#allocation11 + $0x38] sm:$0xff]  ;;  %v557_v40 = vld [vmem:[#allocation13 + $0x28] sm:$0xff] }
  0x78   :  { %288 = vmatmul.mubr.f32.vlgmr.msra.gmra.mxu0 %v1245_v49  ;;  %765 = vmatprep.subr.mxu0 %v1132_v0  ;;  %v558_v38 = vld [vmem:[#allocation13 + $0x30] sm:$0xff]  ;;  %v464_v41 = vld [vmem:[#allocation11 + $0x28] sm:$0xff]  ;;  %v556_v42 = vld [vmem:[#allocation13 + $0x20] sm:$0xff] }
  0x79   :  { %766 = vmatpush3.msra.mxu0 %v380_v50  ;;  %797 = vmatprep.mubr.msk.f32.mxu0 %vm1133_vm0, %v1132_v0  ;;  %v465_v39 = vld [vmem:[#allocation11 + $0x30] sm:$0xff]  ;;  %v463_v43 = vld [vmem:[#allocation11 + $0x20] sm:$0xff]  ;;  %v555_v44 = vld [vmem:[#allocation13 + $0x18] sm:$0xff] }
  0x7a   :  { %767 = vmatprep.subr.mxu0 %v1132_v0  ;;  %359 = vmatmul.mubr.f32.vlgmr.msra.gmra.mxu1 %v1245_v49  ;;  %v462_v45 = vld [vmem:[#allocation11 + $0x18] sm:$0xff]  ;;  %v554_v46 = vld [vmem:[#allocation13 + $0x10] sm:$0xff]  ;;  %v553_v48 = vld [vmem:[#allocation13 + $0x8] sm:$0xff] }
  0x7b   :  { %768 = vmatpush3.msra.mxu0 %v379_v52  ;;  %800 = vmatprep.subr.mxu1 %v1132_v0  ;;  %v461_v47 = vld [vmem:[#allocation11 + $0x10] sm:$0xff]  ;;  %v460_v49 = vld [vmem:[#allocation11 + $0x8] sm:$0xff]  ;;  %v552_v50 = vld [vmem:[#allocation13] sm:$0xff] }
  0x7c   :  { %769 = vmatprep.subr.mxu0 %v1132_v0  ;;  %801 = vmatpush3.msra.mxu1 %v474_v21  ;;  %v136_v51 = vld [vmem:[#allocation7] sm:$0xff]  ;;  %v459_v52 = vld [vmem:[#allocation11] sm:$0xff]  ;;  %v201_v56 = vld [vmem:[%s1331_s4] sm:$0xf] }
  0x7d   :  { %770 = vmatpush3.msra.mxu0 %v378_v55  ;;  %802 = vmatprep.subr.mxu1 %v1132_v0  ;;  %v205_v55 = vsub.s32 0, %v204_v54  ;;  %v210_v59 = vrot.slane %v201_v56, %v209_v57 }
  0x7e   :  { %771 = vmatprep.subr.mxu0 %v1132_v0  ;;  %803 = vmatpush3.msra.mxu1 %v473_v23 }
  0x7f   :  { %772 = vmatpush3.msra.mxu0 %v377_v58  ;;  %804 = vmatprep.subr.mxu1 %v1132_v0  ;;  %v206_v58 = vrot.slane %v201_v56, %v205_v55 }
  0x80   :  { %773 = vmatprep.subr.mxu0 %v1132_v0  ;;  %805 = vmatpush3.msra.mxu1 %v472_v25 }
  0x81   :  { %774 = vmatpush3.msra.mxu0 %v376_v61  ;;  %806 = vmatprep.subr.mxu1 %v1132_v0 }
  0x82   :  { %775 = vmatprep.subr.mxu0 %v1132_v0  ;;  %807 = vmatpush3.msra.mxu1 %v471_v27 }
  0x83   :  { %776 = vmatpush3.msra.mxu0 %v375_v1  ;;  %808 = vmatprep.subr.mxu1 %v1132_v0 }
  0x84   :  { %777 = vmatprep.subr.mxu0 %v1132_v0  ;;  %809 = vmatpush3.msra.mxu1 %v470_v29 }
  0x85   :  { %778 = vmatpush3.msra.mxu0 %v374_v4  ;;  %810 = vmatprep.subr.mxu1 %v1132_v0 }
  0x86   :  { %779 = vmatprep.subr.mxu0 %v1132_v0  ;;  %811 = vmatpush3.msra.mxu1 %v469_v31 }
  0x87   :  { %780 = vmatpush3.msra.mxu0 %v373_v6  ;;  %812 = vmatprep.subr.mxu1 %v1132_v0  ;;  %v217_v6 = vsub.s32 3, %v204_v54 }
  0x88   :  { %781 = vmatprep.subr.mxu0 %v1132_v0  ;;  %813 = vmatpush3.msra.mxu1 %v468_v33 }
  0x89   :  { %782 = vmatpush3.msra.mxu0 %v372_v7  ;;  %814 = vmatprep.subr.mxu1 %v1132_v0  ;;  %v214_v7 = vrot.slane %v201_v56, %v213_v5 }
  0x8a   :  { %783 = vmatprep.subr.mxu0 %v1132_v0  ;;  %815 = vmatpush3.msra.mxu1 %v467_v35 }
  0x8b   :  { %784 = vmatpush3.msra.mxu0 %v371_v8  ;;  %816 = vmatprep.subr.mxu1 %v1132_v0  ;;  %v218_v8 = vrot.slane %v201_v56, %v217_v6 }
  0x8c   :  { %785 = vmatprep.subr.mxu0 %v1132_v0  ;;  %817 = vmatpush3.msra.mxu1 %v466_v37 }
  0x8d   :  { %786 = vmatpush3.msra.mxu0 %v370_v9  ;;  %818 = vmatprep.subr.mxu1 %v1132_v0 }
  0x8e   :  { %787 = vmatprep.subr.mxu0 %v1132_v0  ;;  %819 = vmatpush3.msra.mxu1 %v465_v39 }
  0x8f   :  { %788 = vmatpush3.msra.mxu0 %v369_v10  ;;  %820 = vmatprep.subr.mxu1 %v1132_v0 }
  0x90   :  { %789 = vmatprep.subr.mxu0 %v1132_v0  ;;  %821 = vmatpush3.msra.mxu1 %v464_v41 }
  0x91   :  { %790 = vmatpush3.msra.mxu0 %v368_v11  ;;  %822 = vmatprep.subr.mxu1 %v1132_v0 }
  0x92   :  { %791 = vmatprep.subr.mxu0 %v1132_v0  ;;  %823 = vmatpush3.msra.mxu1 %v463_v43 }
  0x93   :  { %792 = vmatpush3.msra.mxu0 %v367_v12  ;;  %824 = vmatprep.subr.mxu1 %v1132_v0 }
  0x94   :  { %793 = vmatprep.subr.mxu0 %v1132_v0  ;;  %825 = vmatpush3.msra.mxu1 %v462_v45 }
  0x95   :  { %794 = vmatpush3.msra.mxu0 %v366_v13  ;;  %826 = vmatprep.subr.mxu1 %v1132_v0  ;;  %v713_v13 = vld [vmem:[%s1337_s10] ss:$0 sm:$0xff] }
  0x96   :  { %795 = vmatprep.subr.mxu0 %v1132_v0  ;;  %827 = vmatpush3.msra.mxu1 %v461_v47 }
  0x97   :  { %796 = vmatpush3.msra.mxu0 %v365_v14  ;;  %828 = vmatprep.subr.mxu1 %v1132_v0 }
  0x98   :  { %798 = vmatmul.mubr.f32.vlgmr.msra.gmra.mxu0 %v135_v15  ;;  %835 = vmatprep.subr.mxu0 %v1132_v0 }
  0x99   :  { %867 = vmatprep.mubr.msk.f32.mxu0 %vm1133_vm0, %v1132_v0  ;;  %836 = vmatpush3.msra.mxu0 %v567_v20 }
  0x9a   :  { %837 = vmatprep.subr.mxu0 %v1132_v0  ;;  %829 = vmatpush3.msra.mxu1 %v460_v49 }
  0x9b   :  { %838 = vmatpush3.msra.mxu0 %v566_v22  ;;  %830 = vmatprep.subr.mxu1 %v1132_v0 }
  0x9c   :  { %839 = vmatprep.subr.mxu0 %v1132_v0  ;;  %831 = vmatpush3.msra.mxu1 %v459_v52 }
  0x9d   :  { %840 = vmatpush3.msra.mxu0 %v565_v24  ;;  %832 = vmatprep.mubr.msk.f32.mxu1 %vm1133_vm0, %v1132_v0 }
  0x9e   :  { %841 = vmatprep.subr.mxu0 %v1132_v0 }
  0x9f   :  { %842 = vmatpush3.msra.mxu0 %v564_v26 }
  0xa0   :  { %843 = vmatprep.subr.mxu0 %v1132_v0 }
  0xa1   :  { %844 = vmatpush3.msra.mxu0 %v563_v28 }
  0xa2   :  { %845 = vmatprep.subr.mxu0 %v1132_v0 }
  0xa3   :  { %846 = vmatpush3.msra.mxu0 %v562_v30 }
  0xa4   :  { %847 = vmatprep.subr.mxu0 %v1132_v0 }
  0xa5   :  { %848 = vmatpush3.msra.mxu0 %v561_v32 }
  0xa6   :  { %849 = vmatprep.subr.mxu0 %v1132_v0 }
  0xa7   :  { %850 = vmatpush3.msra.mxu0 %v560_v34 }
  0xa8   :  { %851 = vmatprep.subr.mxu0 %v1132_v0 }
  0xa9   :  { %852 = vmatpush3.msra.mxu0 %v559_v36 }
  0xaa   :  { %853 = vmatprep.subr.mxu0 %v1132_v0 }
  0xab   :  { %854 = vmatpush3.msra.mxu0 %v558_v38 }
  0xac   :  { %855 = vmatprep.subr.mxu0 %v1132_v0 }
  0xad   :  { %856 = vmatpush3.msra.mxu0 %v557_v40 }
  0xae   :  { %857 = vmatprep.subr.mxu0 %v1132_v0 }
  0xaf   :  { %858 = vmatpush3.msra.mxu0 %v556_v42 }
  0xb0   :  { %859 = vmatprep.subr.mxu0 %v1132_v0 }
  0xb1   :  { %860 = vmatpush3.msra.mxu0 %v555_v44 }
  0xb2   :  { %861 = vmatprep.subr.mxu0 %v1132_v0 }
  0xb3   :  { %862 = vmatpush3.msra.mxu0 %v554_v46 }
  0xb4   :  { %863 = vmatprep.subr.mxu0 %v1132_v0 }
  0xb5   :  { %864 = vmatpush3.msra.mxu0 %v553_v48 }
  0xb6   :  { %865 = vmatprep.subr.mxu0 %v1132_v0  ;;  %v711_v0 = vld [vmem:[%s1333_s6] ss:$0 sm:$0xff]  ;;  %s1134_s6 = smov [#allocation15]  }
  0xb7   :  { %866 = vmatpush3.msra.mxu0 %v552_v50  ;;  %s668_s16 = sshll.u32 %s1134_s6, 4  ;;  %s669_s16 = int_to_ptr.vmem [resolvable:$true] %s668_s16 }
  0xb8   :  { %868 = vmatmul.mubr.f32.vlgmr.msra.gmra.mxu0 %v136_v51  ;;  %s1027_s19 = scalar_lea.vmem %s669_s16, 128  ;;  %p1032_p8 = scmp.lt.s32.totalorder %s669_s16, %s669_s16 }
  0xb9   :  { %p1028_p7 = scmp.ne.s32.totalorder %s669_s16, %s1027_s19  ;;  %p1033_p9 = scmp.lt.s32.totalorder %s1027_s19, %s1027_s19 }
  0xbb   :  { %p1034_p10 = por %p1033_p9, %p1032_p8 }
  0xbd   :  { %p1035_p11 = pnand %p1034_p10, %p1028_p7 }
 0x138   :  { %v289_v60 = vpop.f32.mrf.mxu0 }
 0x139   :  { %v290_v61 = vadd.f32 %v289_v60, %v206_v58 }
 0x13a   :  { %v291_v62 = vpop.f32.mrf.mxu0  ;;  %v360_v9 = vpop.f32.mrf.mxu1 }
 0x13b   :  { %645 = vst [vmem:[#allocation14] sm:$0xff] %v290_v61  ;;  %v292_v63 = vadd.f32 %v291_v62, %v210_v59  ;;  %v361_v10 = vadd.f32 %v360_v9, %v214_v7 }
 0x13c   :  { %v362_v11 = vpop.f32.mrf.mxu1 }
 0x13d   :  { %646 = vst [vmem:[#allocation14 + $0x8] sm:$0xff] %v292_v63  ;;  %647 = vst [vmem:[#allocation14 + $0x10] sm:$0xff] %v361_v10  ;;  %v363_v12 = vadd.f32 %v362_v11, %v218_v8 }
 0x13f   :  { %648 = vst [vmem:[#allocation14 + $0x18] sm:$0xff] %v363_v12 }
 0x158   :  { %v454_v1 = vpop.f32.mrf.mxu0 }
 0x159   :  { %v455_v2 = vadd.f32 %v711_v0, %v454_v1 }
 0x15a   :  { %v799_v3 = vpop.f32.mrf.mxu0 }
 0x15b   :  { %v458_v4 = vmax.f32 %v455_v2, 0.0 }
 0x15d   :  { %649 = vst [vmem:[#allocation15] sm:$0xff] %v458_v4  ;;  %833 = vmatmul.mubr.f32.vlgmr.msra.gmra.mxu1 %v458_v4 }
 0x178   :  { %v641_v14 = vpop.f32.mrf.mxu0 }
 0x179   :  { %v642_v15 = vadd.f32 %v713_v13, %v641_v14 }
 0x17a   :  { %v869_v16 = vpop.f32.mrf.mxu0 }
 0x17b   :  { %651 = vst [vmem:[#allocation18] sm:$0xff] %v642_v15 }
 0x17c   :  { %1038 = shalt.err (!%p1035_p11)
}
 0x17d   :  { %671 = dma.vmem_to_hbm [thread:$0]  %s669_s16, 128, %s1339_s12, [#allocation16]  }
 0x17e   :  { %s1047_s10 = scalar_lea.vmem %s659_s18, 512  ;;  %p1052_p13 = scmp.lt.s32.totalorder %s659_s18, %s659_s18 }
 0x17f   :  { %p1048_p12 = scmp.ne.s32.totalorder %s659_s18, %s1047_s10  ;;  %p1053_p0 = scmp.lt.s32.totalorder %s1047_s10, %s1047_s10 }
 0x181   :  { %p1054_p1 = por %p1053_p0, %p1052_p13 }
 0x183   :  { %p1055_p2 = pnand %p1054_p1, %p1048_p12 }
 0x185   :  { %1058 = shalt.err (!%p1055_p2)
}
 0x186   :  { %661 = dma.vmem_to_hbm [thread:$0]  %s659_s18, 512, %s1338_s11, [#allocation4]  }
 0x187   :  { %s1136_s7 = smov [#allocation18]  }
 0x188   :  { %s688_s24 = sshll.u32 %s1136_s7, 4  ;;  %s689_s24 = int_to_ptr.vmem [resolvable:$true] %s688_s24 }
 0x189   :  { %s1067_s25 = scalar_lea.vmem %s689_s24, 128  ;;  %p1072_p4 = scmp.lt.s32.totalorder %s689_s24, %s689_s24 }
 0x18a   :  { %p1068_p3 = scmp.ne.s32.totalorder %s689_s24, %s1067_s25  ;;  %p1073_p5 = scmp.lt.s32.totalorder %s1067_s25, %s1067_s25 }
 0x18c   :  { %p1074_p6 = por %p1073_p5, %p1072_p4 }
 0x18e   :  { %p1075_p7 = pnand %p1074_p6, %p1068_p3 }
 0x190   :  { %1078 = shalt.err (!%p1075_p7)
}
 0x191   :  { %691 = dma.vmem_to_hbm [thread:$0]  %s689_s24, 128, %s1341_s14, [#allocation19]   ;;  %v712_v17 = vld [vmem:[%s1335_s8] ss:$0 sm:$0xff] }
 0x192   :  { %s1137_s28 = smov [#allocation17]  }
 0x193   :  { %s678_s11 = sshll.u32 %s1137_s28, 4  ;;  %s679_s11 = int_to_ptr.vmem [resolvable:$true] %s678_s11 }
 0x194   :  { %s1087_s1 = scalar_lea.vmem %s679_s11, 128  ;;  %p1092_p9 = scmp.lt.s32.totalorder %s679_s11, %s679_s11 }
 0x195   :  { %p1088_p8 = scmp.ne.s32.totalorder %s679_s11, %s1087_s1  ;;  %p1093_p10 = scmp.lt.s32.totalorder %s1087_s1, %s1087_s1 }
 0x197   :  { %p1094_p11 = por %p1093_p10, %p1092_p9 }
 0x199   :  { %p1095_p12 = pnand %p1094_p11, %p1088_p8 }
 0x21d   :  { %v548_v18 = vpop.f32.mrf.mxu1 }
 0x21e   :  { %v549_v19 = vadd.f32 %v712_v17, %v548_v18 }
 0x21f   :  { %v834_v20 = vpop.f32.mrf.mxu1 }
 0x220   :  { %650 = vst [vmem:[#allocation17] sm:$0xff] %v549_v19 }
 0x221   :  { %1098 = shalt.err (!%p1095_p12)
}
 0x222   :  { %681 = dma.vmem_to_hbm [thread:$0]  %s679_s11, 128, %s1340_s13, [#allocation16]  }
 0x223   :  { %1115 = dma.done.wait [#allocation4], 512  }
 0x224   :  { %1116 = vsyncadd [#allocation4], 4294966784 }
 0x225   :  { %1117 = dma.done.wait [#allocation16], 256  }
 0x226   :  { %1118 = vsyncadd [#allocation16], 4294967040 }
 0x227   :  { %1119 = dma.done.wait [#allocation19], 128  }
 0x228   :  { %1120 = vsyncadd [#allocation19], 4294967168 }
 0x229   :  { %704 = vsyncpa [#allocation3], 1 }
 0x22a   :  { %705 = vsyncpa [#allocation6], 1 }
 0x22b   :  { %706 = vsyncpa [#allocation9], 1 }
 0x22c   :  { %707 = vsyncpa [#allocation12], 1 }
 0x22d   :  { %708 = vsyncpa [#allocation4], 1 }
 0x22e   :  { %709 = vsyncpa [#allocation16], 1 }
 0x22f   :  { %710 = vsyncpa [#allocation19], 1 }

</bundles_post_ra>
